<compile_context>
chip_gen: v7x
topology: tpu7x:2x2x1
jax: 0.10.0
libtpu: 0.0.40
codegen_flags: <defaults>
</compile_context>

<pallas_src>
import functools

import jax
import jax.numpy as jnp
from jax.experimental import pallas as pl
from jax.experimental.pallas import tpu as pltpu

_MIB = 1024 * 1024


def _round_up(n, m):
    return int(pl.cdiv(n, m)) * m


def _vmem_capacity_bytes():
    """Physical VMEM of the local TPU; conservative fallback if unqueryable."""
    try:
        return int(pltpu.get_tpu_info().vmem_capacity_bytes)
    except Exception:
        return 64 * _MIB  # v7x-sized fallback; safe on every generation


def _rmsnorm_kernel(inv_d, eps, x_ref, w_ref, o_ref):
    # x_ref: (row_tile, D) in the input dtype; w_ref: (1, D) f32 (VMEM-resident).
    x32 = x_ref[...].astype(jnp.float32)
    # sum(x^2) * (1/D): cross-lane reduce on the XLU + one VPU multiply (no divide).
    ssq = jnp.sum(x32 * x32, axis=-1, keepdims=True)          # (row_tile, 1)
    inv = jax.lax.rsqrt(ssq * inv_d + eps)                    # EUP rsqrt
    # Weight multiply stays in f32, single cast at the end (matches GLM exactly).
    o_ref[...] = (w_ref[...] * (x32 * inv)).astype(o_ref.dtype)


def glm_rmsnorm(x, weight, eps=1e-5, row_tile=None):
    """GLM RMSNorm. x: (..., D), weight: (D,). Returns x's shape/dtype."""
    orig_shape = x.shape
    D = orig_shape[-1]
    x2 = x.reshape(-1, D)
    rows = x2.shape[0]

    itemsize = jnp.dtype(x.dtype).itemsize
    # Rows per packed vreg for this dtype: 8 (f32), 16 (bf16/f16), 32 (int8/fp8).
    sublane = max(8, 32 // itemsize)
    # Internal lane-padded width (for the VMEM cost model only -- the block
    # itself uses the true D).
    d_lanes = _round_up(D, 128)

    # ---- VMEM budget & row-tile selection ---------------------------------
    vmem_cap = _vmem_capacity_bytes()
    # Scoped limit: half of physical, capped at 64 MiB (v7x has 64 MiB / TC;
    # v5e/v6e have 128 MiB and therefore get the larger budget).
    vmem_limit = min(vmem_cap // 2, 64 * _MIB)

    # Per-row VMEM cost: double-buffered input + output blocks plus ~3 rows of
    # f32 temporaries materialized by the body.
    per_row = 4 * d_lanes * itemsize + 12 * d_lanes
    usable = (3 * vmem_limit) // 4  # leave headroom for the compiler
    budget_rows = max(sublane, (usable // per_row) // sublane * sublane)

    if row_tile is None:
        t = min(1024, budget_rows)  # 512-1024 rows ≈ HBM roofline for streaming kernels
    else:
        t = max(sublane, (int(row_tile) // sublane) * sublane)
    # A block equal to the full row extent is always legal; otherwise keep the
    # tile a multiple of the packed-sublane count (last block may be partial).
    row_tile = rows if rows <= t else t

    # Make sure the scoped limit covers whatever tile we ended up with.
    needed = _round_up(row_tile, sublane) * per_row + 4 * d_lanes + 2 * _MIB
    vmem_limit = int(min(max(vmem_limit, needed),
                         max(vmem_cap - 8 * _MIB, 16 * _MIB)))

    # Weight pre-cast to f32 once in the wrapper (tiny, fetched once into VMEM).
    w2 = weight.astype(jnp.float32).reshape(1, D)

    grid = (int(pl.cdiv(rows, row_tile)),)
    kernel = functools.partial(_rmsnorm_kernel, float(1.0 / D), float(eps))

    out = pl.pallas_call(
        kernel,
        out_shape=jax.ShapeDtypeStruct((rows, D), x.dtype),
        grid_spec=pltpu.PrefetchScalarGridSpec(
            num_scalar_prefetch=0,
            grid=grid,
            in_specs=[
                pl.BlockSpec((row_tile, D), lambda i: (i, 0)),
                # Whole (1, D) f32 weight resident in VMEM, fetched once.
                pl.BlockSpec(memory_space=pltpu.MemorySpace.VMEM),
            ],
            out_specs=pl.BlockSpec((row_tile, D), lambda i: (i, 0)),
        ),
        compiler_params=pltpu.CompilerParams(
            dimension_semantics=("parallel",),  # row grid shards over TCs on v7x
            vmem_limit_bytes=vmem_limit,
        ),
    )(x2, w2)

    return out.reshape(orig_shape)


# TODO(synk): only the default rmsnorm=True branch of GLMLayerNorm is implemented;
# the rmsnorm=False (torch.nn.LayerNorm) branch is not.


if __name__ == "__main__":
    key = jax.random.PRNGKey(0)
    eps = 1e-5

    def reference(x, w, eps):
        x32 = x.astype(jnp.float32)
        var = jnp.mean(x32 * x32, axis=-1, keepdims=True)
        return (w.astype(jnp.float32) * (x32 * jax.lax.rsqrt(var + eps))).astype(x.dtype)

    k1, k2, k3, k4, k5, k6 = jax.random.split(key, 6)

    # Case 1: f32, (batch=2, seq=8, hidden=32) -- small lane-sparse hidden.
    x1 = jax.random.normal(k1, (2, 8, 32), dtype=jnp.float32)
    w1 = jax.random.normal(k2, (32,), dtype=jnp.float32) * 0.1 + 1.0
    y1 = jax.block_until_ready(glm_rmsnorm(x1, w1, eps=eps))
    r1 = reference(x1, w1, eps)
    assert y1.shape == x1.shape and y1.dtype == x1.dtype
    assert jnp.allclose(y1, r1, atol=1e-5, rtol=1e-5), "f32 mismatch vs reference"

    # Case 2: bf16, ragged rows + non-128 hidden (exercises edge-masked blocks).
    x2 = jax.random.normal(k3, (3, 7, 160), dtype=jnp.float32).astype(jnp.bfloat16)
    w2 = (jax.random.normal(k4, (160,), dtype=jnp.float32) * 0.1 + 1.0).astype(jnp.bfloat16)
    y2 = jax.block_until_ready(glm_rmsnorm(x2, w2, eps=eps))
    r2 = reference(x2, w2, eps)
    assert y2.shape == x2.shape and y2.dtype == x2.dtype
    assert jnp.allclose(y2.astype(jnp.float32), r2.astype(jnp.float32),
                        atol=2e-2, rtol=2e-2), "bf16 mismatch vs reference"

    # Case 3: bf16, rows not a multiple of the row tile, lane-aligned hidden
    # (exercises a partial last row-block with a forced small tile).
    x3 = jax.random.normal(k5, (1, 13, 256), dtype=jnp.float32).astype(jnp.bfloat16)
    w3 = (jax.random.normal(k6, (256,), dtype=jnp.float32) * 0.1 + 1.0).astype(jnp.bfloat16)
    y3 = jax.block_until_ready(glm_rmsnorm(x3, w3, eps=eps, row_tile=16))
    r3 = reference(x3, w3, eps)
    assert y3.shape == x3.shape and y3.dtype == x3.dtype
    assert jnp.allclose(y3.astype(jnp.float32), r3.astype(jnp.float32),
                        atol=2e-2, rtol=2e-2), "bf16 partial-block mismatch vs reference"

    print("KERNEL_OK")
</pallas_src>

<mosaic_0001>
module attributes {stable_mosaic.version = 11 : i64} {
  func.func @_rmsnorm_kernel(%arg0: i32, %arg1: memref<16x32xf32, #tpu.memory_space<vmem>>, %arg2: memref<1x32xf32, #tpu.memory_space<vmem>>, %arg3: memref<16x32xf32, #tpu.memory_space<vmem>>) attributes {dimension_semantics = [#tpu.dimension_semantics<parallel>], iteration_bounds = array<i64: 1>, scalar_prefetch = 0 : i64, scratch_operands = 0 : i64, tpu.core_type = #tpu.core_type<tc>, window_params = [{transform_indices = @transform_0, window_bounds = array<i64: 16, 32>}, {pipeline_mode = #tpu.pipeline_mode<synchronous>, transform_indices = @transform_1, window_bounds = array<i64: 1, 32>}, {transform_indices = @transform_2, window_bounds = array<i64: 16, 32>}]} {
    %c0 = arith.constant 0 : index
    %c0_0 = arith.constant 0 : index
    %0 = vector.load %arg1[%c0, %c0_0] : memref<16x32xf32, #tpu.memory_space<vmem>>, vector<16x32xf32>
    %1 = arith.mulf %0, %0 : vector<16x32xf32>
    %cst = arith.constant dense<0.000000e+00> : vector<16xf32>
    %2 = vector.multi_reduction <add>, %1, %cst [1] : vector<16x32xf32> to vector<16xf32>
    %3 = vector.shape_cast %2 : vector<16xf32> to vector<16x1xf32>
    %cst_1 = arith.constant 3.125000e-02 : f32
    %4 = vector.broadcast %cst_1 : f32 to vector<16x1xf32>
    %5 = arith.mulf %3, %4 : vector<16x1xf32>
    %cst_2 = arith.constant 9.99999974E-6 : f32
    %6 = vector.broadcast %cst_2 : f32 to vector<16x1xf32>
    %7 = arith.addf %5, %6 : vector<16x1xf32>
    %8 = math.rsqrt %7 : vector<16x1xf32>
    %c0_3 = arith.constant 0 : index
    %c0_4 = arith.constant 0 : index
    %9 = vector.load %arg2[%c0_3, %c0_4] : memref<1x32xf32, #tpu.memory_space<vmem>>, vector<1x32xf32>
    %10 = vector.broadcast %8 : vector<16x1xf32> to vector<16x32xf32>
    %11 = arith.mulf %0, %10 : vector<16x32xf32>
    %12 = vector.broadcast %9 : vector<1x32xf32> to vector<16x32xf32>
    %13 = arith.mulf %12, %11 : vector<16x32xf32>
    %c0_5 = arith.constant 0 : index
    %c0_6 = arith.constant 0 : index
    %14 = vector.load %arg3[%c0_5, %c0_6] : memref<16x32xf32, #tpu.memory_space<vmem>>, vector<16x32xf32>
    tpu.vector_store %arg3[%c0_5, %c0_6], %13 {strides = array<i32>} : memref<16x32xf32, #tpu.memory_space<vmem>>, vector<16x32xf32>,
    return
  }
  func.func @transform_0(%arg0: i32) -> (i32, i32) {
    %c0_i32 = arith.constant 0 : i32
    %c0_i32_0 = arith.constant 0 : i32
    return %arg0, %c0_i32 : i32, i32
  }
  func.func @transform_1(%arg0: i32) -> (i32, i32) {
    %c0_i32 = arith.constant 0 : i32
    %c0_i32_0 = arith.constant 0 : i32
    %c0_i32_1 = arith.constant 0 : i32
    return %c0_i32, %c0_i32_0 : i32, i32
  }
  func.func @transform_2(%arg0: i32) -> (i32, i32) {
    %c0_i32 = arith.constant 0 : i32
    %c0_i32_0 = arith.constant 0 : i32
    return %arg0, %c0_i32 : i32, i32
  }
}

</mosaic_0001>

<bundles_post_ra>
// kernel: tpu_custom_call.1
= control target key start
LH: loop header
LB: loop body
LE: loop exit
PB: predicated region body
PF: predicated region fallthrough
CT: control target
= control target key end

     0   :  { %7 = vsyncpa [#allocation3], 0  ;;  %s186_s0 = inlined_call_operand.hbm [shape: f32[16,32], index: 0, kind: input, shape index: {}]   ;;  %s187_s1 = inlined_call_operand.vmem [shape: f32[1,32], index: 1, kind: input, shape index: {}]   ;;  %s188_s2 = inlined_call_operand.hbm [shape: f32[16,32], index: 2, kind: output, shape index: {}]  }
   0x1   :  { %8 = vsyncpa [#allocation4], 0  ;;  %s130_s9 = smov [#allocation2]   ;;  %s82_s13 = scalar_lea.hbm %s186_s0, 256 }
   0x2   :  { %s14_s10 = sshll.u32 %s130_s9, 4  ;;  %p83_p0 = scmp.ne.s32.totalorder %s186_s0, %s82_s13  ;;  %s15_s10 = int_to_ptr.vmem [resolvable:$true] %s14_s10 }
   0x3   :  { %p86_p1 = scmp.lt.u32.totalorder %s82_s13, %s186_s0 }
   0x5   :  { %p88_p2 = pnand %p86_p1, %p83_p0 }
   0x7   :  { %91 = shalt.err (!%p88_p2)
}
   0x8   :  { %s92_s18 = scalar_lea.vmem %s15_s10, 256  ;;  %p97_p4 = scmp.lt.s32.totalorder %s15_s10, %s15_s10 }
   0x9   :  { %p93_p3 = scmp.ne.s32.totalorder %s15_s10, %s92_s18  ;;  %p98_p5 = scmp.lt.s32.totalorder %s92_s18, %s92_s18 }
   0xb   :  { %p99_p6 = por %p98_p5, %p97_p4 }
   0xd   :  { %p100_p7 = pnand %p99_p6, %p93_p3 }
   0xf   :  { %103 = shalt.err (!%p100_p7)
}
  0x10   :  { %s131_s19 = smov 128   ;;  %s132_s20 = smov 8  }
  0x11   :  { %20 = dma.hbm_to_vmem [thread:$0]  %s186_s0, 256, %s15_s10, [#allocation3], %s131_s19, %s131_s19, %s132_s20  }
  0x12   :  { %126 = dma.done.wait [#allocation3], 256  }
  0x13   :  { %127 = vsyncadd [#allocation3], 4294967040  ;;  %v26_v0 = vld [vmem:[#allocation2] sm:$0xff]  ;;  %vm30_vm0 = vcmask 261120   ;;  %v27_v1 = vld [vmem:[#allocation2 + $0x8] sm:$0xff]  ;;  %s133_s24 = smov [#allocation5]  }
  0x14   :  { %v28_v2 = vmul.f32 %v26_v0, %v26_v0  ;;  %v29_v3 = vmul.f32 %v27_v1, %v27_v1  ;;  %v73_v13 = vld [vmem:[%s187_s1] ss:$0 sm:$0xff]  ;;  %s61_s25 = sshll.u32 %s133_s24, 4  ;;  %s62_s25 = int_to_ptr.vmem [resolvable:$true] %s61_s25 }
  0x15   :  { %s104_s26 = scalar_lea.vmem %s62_s25, 256  ;;  %p109_p9 = scmp.lt.s32.totalorder %s62_s25, %s62_s25 }
  0x16   :  { %v31_v4 = vsel %vm30_vm0, %v28_v2, 0.0  ;;  %v34_v5 = vsel %vm30_vm0, %v29_v3, 0.0  ;;  %p105_p8 = scmp.ne.s32.totalorder %s62_s25, %s104_s26  ;;  %p110_p10 = scmp.lt.s32.totalorder %s104_s26, %s104_s26 }
  0x17   :  { %32 = vadd.xlane.f32.xlu0 %v31_v4 }
  0x18   :  { %p111_p11 = por %p110_p10, %p109_p9 }
  0x1a   :  { %p112_p12 = pnand %p111_p11, %p105_p8 }
  0x1b   :  { %35 = vadd.xlane.f32.xlu0 %v34_v5 }
  0xa4   :  { %v33_v6 = vpop.xlane.xlu0 %32 }
  0xa5   :  { %v37_v7 = vmul.f32 0.03125, %v33_v6 }
  0xa7   :  { %v39_v8 = vadd.f32 1e-05, %v37_v7 }
  0xa8   :  { %v36_v9 = vpop.xlane.xlu0 %35 }
  0xa9   :  { %78 = vrsqrt.f32 %v39_v8  ;;  %v38_v10 = vmul.f32 0.03125, %v36_v9 }
  0xab   :  { %v40_v11 = vadd.f32 1e-05, %v38_v10 }
  0xad   :  { %80 = vrsqrt.f32 %v40_v11 }
  0xb3   :  { %v79_v12 = vpop.eup %78 }
  0xb4   :  { %v44_v14 = vmul.f32 %v79_v12, %v26_v0 }
  0xb6   :  { %v52_v15 = vmul.f32 %v73_v13, %v44_v14 }
  0xb7   :  { %v81_v16 = vpop.eup %80 }
  0xb8   :  { %v45_v17 = vmul.f32 %v81_v16, %v27_v1  ;;  %54 = vst.msk [vmem:[#allocation5] sm:$0xff] %vm30_vm0, %v52_v15 }
  0xba   :  { %v53_v18 = vmul.f32 %v73_v13, %v45_v17 }
  0xbc   :  { %55 = vst.msk [vmem:[#allocation5 + $0x8] sm:$0xff] %vm30_vm0, %v53_v18 }
  0xbd   :  { %115 = shalt.err (!%p112_p12)
}
  0xbe   :  { %s116_s28 = scalar_lea.hbm %s188_s2, 256 }
  0xbf   :  { %p117_p13 = scmp.ne.s32.totalorder %s188_s2, %s116_s28  ;;  %p120_p0 = scmp.lt.u32.totalorder %s116_s28, %s188_s2 }
  0xc1   :  { %p122_p1 = pnand %p120_p0, %p117_p13 }
  0xc3   :  { %125 = shalt.err (!%p122_p1)
}
  0xc4   :  { %67 = dma.vmem_to_hbm [thread:$0]  %s62_s25, 256, %s188_s2, [#allocation4], %s131_s19, %s131_s19, %s132_s20  }
  0xc5   :  { %128 = dma.done.wait [#allocation4], 256  }
  0xc6   :  { %129 = vsyncadd [#allocation4], 4294967040 }
  0xc7   :  { %71 = vsyncpa [#allocation3], 1 }
  0xc8   :  { %72 = vsyncpa [#allocation4], 1 }

</bundles_post_ra>
